<compile_context>
chip_gen: v7x
topology: tpu7x:2x2x1
jax: 0.10.0
libtpu: 0.0.40
codegen_flags: <defaults>
</compile_context>

<pallas_src>
import functools

import jax
import jax.numpy as jnp
from jax.experimental import pallas as pl
from jax.experimental.pallas import tpu as pltpu

_LANE = 128  # TPU vreg lane width


def _cdiv(a, b):
    return -(-a // b)


def _round_up(a, m):
    return _cdiv(a, m) * m


def _has_bf16_vector_unit():
    """bf16 VPU/EUP exists on TPU v6e and newer; v5e/v5p/v4 (and unknown) -> f32."""
    try:
        kind = jax.devices()[0].device_kind.lower()
    except Exception:  # pragma: no cover - defensive
        return False
    return any(tag in kind for tag in ("v6", "v7", "7x"))


def _discrim_kernel(x_ref, w1_ref, b1_ref, w2_ref, b2_ref, w3_ref, b3_ref, o_ref,
                    *, act_dtype):
    # x_ref: (TB, D) batch-major input tile (no wrapper relayout)
    # w1: (H1, D)  b1: (H1, 1)  w2: (H2, H1)  b2: (H2, 1)  w3: (1, H2)  b3: (1, 1)
    # o_ref: (1, TB)  -- batch on the 128-lane axis -> lane-dense store
    f32 = jnp.float32
    x = x_ref[...]                                              # (TB, D) f32

    # Layer 1: z1[h, b] = sum_d w1[h, d] * x[b, d]  -> (H1, TB)
    # (transposed-RHS contraction; same pattern as q @ k^T, natively MXU-supported)
    z1 = jax.lax.dot_general(
        w1_ref[...], x, (((1,), (1,)), ((), ())),
        preferred_element_type=f32) + b1_ref[...]
    h1 = jnp.tanh(z1.astype(act_dtype))                         # EUP; bf16 on v6e/v7x

    # Layer 2: (H2, TB)
    z2 = jnp.dot(w2_ref[...].astype(act_dtype), h1,
                 preferred_element_type=f32) + b2_ref[...]
    h2 = jnp.tanh(z2.astype(act_dtype))

    # Output layer (+Identity), then sigmoid -> (1, TB) lane-dense store.
    z3 = jnp.dot(w3_ref[...].astype(act_dtype), h2,
                 preferred_element_type=f32) + b3_ref[...]
    o_ref[...] = jax.nn.sigmoid(z3)


def discriminator_forward(x, params, *, tb=4096, activation_dtype=None):
    """Forward pass of the Discriminator.

    x: [B, D] float32 (D = obs_dim + act_dim, pre-concatenated by the caller).
    params: w1(H1,D) b1(H1,1) w2(H2,H1) b2(H2,1) w3(1,H2) b3(1,1), all float32.
    activation_dtype: None (auto: bf16 on v6e/v7x, f32 otherwise) or an explicit dtype.
    Returns [B, 1] float32 probabilities.
    """
    w1, b1, w2, b2, w3, b3 = (params[k] for k in ("w1", "b1", "w2", "b2", "w3", "b3"))
    B, D = x.shape
    H1, H2 = w1.shape[0], w2.shape[0]

    if activation_dtype is None:
        activation_dtype = jnp.bfloat16 if _has_bf16_vector_unit() else jnp.float32

    # ---- batch-tile selection ----------------------------------------------------
    tb_cap = max(_LANE, (int(tb) // _LANE) * _LANE)   # user cap, lane-aligned
    n_steps = max(2, _cdiv(B, tb_cap))                # >=2 steps: v7x megacore + DMA overlap
    if n_steps % 2:                                   # prefer an even step count
        n_steps += 1
    TB = max(_LANE, _round_up(_cdiv(B, n_steps), _LANE))  # near-full (ragged) last tile
    grid = _cdiv(B, TB)

    kernel = functools.partial(_discrim_kernel, act_dtype=activation_dtype)
    const = lambda a: pl.BlockSpec(a.shape, lambda i: (0, 0))   # VMEM-resident params

    n_param = sum(int(p.size) for p in (w1, b1, w2, b2, w3, b3))
    cost = pl.CostEstimate(
        flops=2 * B * (D * H1 + H1 * H2 + H2),
        transcendentals=B * (H1 + H2 + 1),
        bytes_accessed=4 * B * (D + 1) + 4 * n_param,
    )

    out = pl.pallas_call(
        kernel,
        out_shape=jax.ShapeDtypeStruct((1, B), jnp.float32),
        grid=(grid,),
        in_specs=[
            pl.BlockSpec((TB, D), lambda i: (i, 0)),   # batch tile of x, no relayout
            const(w1), const(b1),
            const(w2), const(b2),
            const(w3), const(b3),
        ],
        out_specs=pl.BlockSpec((1, TB), lambda i: (0, i)),  # lane-dense output tile
        compiler_params=pltpu.CompilerParams(
            dimension_semantics=("parallel",),
        ),
        cost_estimate=cost,
    )(x, w1, b1, w2, b2, w3, b3)

    # (1, B) -> (B, 1)  (one dim is 1, so reshape == transpose; ~4 B/sample)
    return out.reshape(B, 1)


def init_params(key, discrim_dim, hidden_sizes):
    """PyTorch-Linear-style init (U[-1/sqrt(fan_in), 1/sqrt(fan_in)]).

    Weights stored in PyTorch (out_features, in_features) layout; biases (out, 1).
    """
    sizes = [discrim_dim] + list(hidden_sizes) + [1]
    params = {}
    for j in range(len(sizes) - 1):
        fan_in, fan_out = sizes[j], sizes[j + 1]
        key, kw, kb = jax.random.split(key, 3)
        bound = 1.0 / jnp.sqrt(fan_in)
        params[f"w{j + 1}"] = jax.random.uniform(
            kw, (fan_out, fan_in), jnp.float32, -bound, bound)
        params[f"b{j + 1}"] = jax.random.uniform(
            kb, (fan_out, 1), jnp.float32, -bound, bound)
    return params


def _reference(x, p):
    hi = jax.lax.Precision.HIGHEST
    h = jnp.tanh(jnp.dot(x, p["w1"].T, precision=hi) + p["b1"].T)
    h = jnp.tanh(jnp.dot(h, p["w2"].T, precision=hi) + p["b2"].T)
    return jax.nn.sigmoid(jnp.dot(h, p["w3"].T, precision=hi) + p["b3"].T)


if __name__ == "__main__":
    key = jax.random.PRNGKey(0)

    # Small shapes consistent with the module: obs_dim=6, act_dim=2 -> discrim_dim=8
    batch = 8
    obs_dim, act_dim = 6, 2
    discrim_dim = obs_dim + act_dim
    hidden_sizes = (32, 32)

    key, kx = jax.random.split(key)
    # "obs" passed to Discriminator.forward is the concatenated (obs, act) vector.
    x = jax.random.normal(kx, (batch, discrim_dim), jnp.float32)
    params = init_params(key, discrim_dim, hidden_sizes)

    # 1) strict numerics (force f32 activations on every chip generation).
    prob = jax.block_until_ready(
        discriminator_forward(x, params, activation_dtype=jnp.float32))
    ref = _reference(x, params)
    assert prob.shape == (batch, 1)
    assert jnp.allclose(prob, ref, atol=1e-4, rtol=1e-4)

    # 2) multi-tile grid + ragged final block (B=1000 -> 2 steps of TB=512), still f32.
    key, kx2 = jax.random.split(key)
    x_big = jax.random.normal(kx2, (1000, discrim_dim), jnp.float32)
    prob_big = jax.block_until_ready(
        discriminator_forward(x_big, params, activation_dtype=jnp.float32))
    ref_big = _reference(x_big, params)
    assert prob_big.shape == (1000, 1)
    assert jnp.allclose(prob_big, ref_big, atol=1e-4, rtol=1e-4)

    # 3) default (auto) activation dtype: bf16 tanh on v6e/v7x, f32 on v5e/older.
    prob_auto = jax.block_until_ready(discriminator_forward(x_big, params))
    assert prob_auto.shape == (1000, 1)
    assert jnp.allclose(prob_auto, ref_big, atol=3e-2, rtol=3e-2)

    print("KERNEL_OK")
</pallas_src>

<mosaic_0001>
module attributes {stable_mosaic.version = 11 : i64} {
  func.func @_discrim_kernel(%arg0: i32, %arg1: memref<128x8xf32, #tpu.memory_space<vmem>>, %arg2: memref<32x8xf32, #tpu.memory_space<vmem>>, %arg3: memref<32x1xf32, #tpu.memory_space<vmem>>, %arg4: memref<32x32xf32, #tpu.memory_space<vmem>>, %arg5: memref<32x1xf32, #tpu.memory_space<vmem>>, %arg6: memref<1x32xf32, #tpu.memory_space<vmem>>, %arg7: memref<1x1xf32, #tpu.memory_space<vmem>>, %arg8: memref<1x128xf32, #tpu.memory_space<vmem>>) attributes {dimension_semantics = [#tpu.dimension_semantics<parallel>], iteration_bounds = array<i64: 1>, scalar_prefetch = 0 : i64, scratch_operands = 0 : i64, tpu.core_type = #tpu.core_type<tc>, window_params = [{transform_indices = @transform_0, window_bounds = array<i64: 128, 8>}, {pipeline_mode = #tpu.pipeline_mode<synchronous>, transform_indices = @transform_1, window_bounds = array<i64: 32, 8>}, {pipeline_mode = #tpu.pipeline_mode<synchronous>, transform_indices = @transform_2, window_bounds = array<i64: 32, 1>}, {pipeline_mode = #tpu.pipeline_mode<synchronous>, transform_indices = @transform_3, window_bounds = array<i64: 32, 32>}, {pipeline_mode = #tpu.pipeline_mode<synchronous>, transform_indices = @transform_4, window_bounds = array<i64: 32, 1>}, {pipeline_mode = #tpu.pipeline_mode<synchronous>, transform_indices = @transform_5, window_bounds = array<i64: 1, 32>}, {pipeline_mode = #tpu.pipeline_mode<synchronous>, transform_indices = @transform_6, window_bounds = array<i64: 1, 1>}, {transform_indices = @transform_7, window_bounds = array<i64: 1, 128>}]} {
    %c0 = arith.constant 0 : index
    %c0_0 = arith.constant 0 : index
    %0 = vector.load %arg1[%c0, %c0_0] : memref<128x8xf32, #tpu.memory_space<vmem>>, vector<128x8xf32>
    %c0_1 = arith.constant 0 : index
    %c0_2 = arith.constant 0 : index
    %1 = vector.load %arg2[%c0_1, %c0_2] : memref<32x8xf32, #tpu.memory_space<vmem>>, vector<32x8xf32>
    %cst = arith.constant dense<0.000000e+00> : vector<32x128xf32>
    %2 = tpu.matmul %1, %0, %cst {dimension_numbers = #tpu.dot_dimension_numbers<[1], [1], [0], [0], [0, 0, 1, 0], [], []>} : vector<32x8xf32>, vector<128x8xf32>, vector<32x128xf32> -> vector<32x128xf32>
    %c0_3 = arith.constant 0 : index
    %c0_4 = arith.constant 0 : index
    %3 = vector.load %arg3[%c0_3, %c0_4] : memref<32x1xf32, #tpu.memory_space<vmem>>, vector<32x1xf32>
    %4 = vector.broadcast %3 : vector<32x1xf32> to vector<32x128xf32>
    %5 = arith.addf %2, %4 : vector<32x128xf32>
    %6 = math.tanh %5 : vector<32x128xf32>
    %c0_5 = arith.constant 0 : index
    %c0_6 = arith.constant 0 : index
    %7 = vector.load %arg4[%c0_5, %c0_6] : memref<32x32xf32, #tpu.memory_space<vmem>>, vector<32x32xf32>
    %cst_7 = arith.constant dense<0.000000e+00> : vector<32x128xf32>
    %8 = tpu.matmul %7, %6, %cst_7 {dimension_numbers = #tpu.dot_dimension_numbers<[1], [0], [0], [1], [0, 0, 1, 1], [], []>} : vector<32x32xf32>, vector<32x128xf32>, vector<32x128xf32> -> vector<32x128xf32>
    %c0_8 = arith.constant 0 : index
    %c0_9 = arith.constant 0 : index
    %9 = vector.load %arg5[%c0_8, %c0_9] : memref<32x1xf32, #tpu.memory_space<vmem>>, vector<32x1xf32>
    %10 = vector.broadcast %9 : vector<32x1xf32> to vector<32x128xf32>
    %11 = arith.addf %8, %10 : vector<32x128xf32>
    %12 = math.tanh %11 : vector<32x128xf32>
    %c0_10 = arith.constant 0 : index
    %c0_11 = arith.constant 0 : index
    %13 = vector.load %arg6[%c0_10, %c0_11] : memref<1x32xf32, #tpu.memory_space<vmem>>, vector<1x32xf32>
    %cst_12 = arith.constant dense<0.000000e+00> : vector<1x128xf32>
    %14 = tpu.matmul %13, %12, %cst_12 {dimension_numbers = #tpu.dot_dimension_numbers<[1], [0], [0], [1], [0, 0, 1, 1], [], []>} : vector<1x32xf32>, vector<32x128xf32>, vector<1x128xf32> -> vector<1x128xf32>
    %c0_13 = arith.constant 0 : index
    %c0_14 = arith.constant 0 : index
    %15 = vector.load %arg7[%c0_13, %c0_14] : memref<1x1xf32, #tpu.memory_space<vmem>>, vector<1x1xf32>
    %16 = vector.broadcast %15 : vector<1x1xf32> to vector<1x128xf32>
    %17 = arith.addf %14, %16 : vector<1x128xf32>
    %18 = arith.negf %17 : vector<1x128xf32>
    %19 = math.exp %18 : vector<1x128xf32>
    %cst_15 = arith.constant 1.000000e+00 : f32
    %20 = vector.broadcast %cst_15 : f32 to vector<1x128xf32>
    %21 = arith.addf %20, %19 : vector<1x128xf32>
    %22 = arith.divf %20, %21 : vector<1x128xf32>
    %c0_16 = arith.constant 0 : index
    %c0_17 = arith.constant 0 : index
    %23 = vector.load %arg8[%c0_16, %c0_17] : memref<1x128xf32, #tpu.memory_space<vmem>>, vector<1x128xf32>
    tpu.vector_store %arg8[%c0_16, %c0_17], %22 {strides = array<i32>} : memref<1x128xf32, #tpu.memory_space<vmem>>, vector<1x128xf32>,
    return
  }
  func.func @transform_0(%arg0: i32) -> (i32, i32) {
    %c0_i32 = arith.constant 0 : i32
    %c0_i32_0 = arith.constant 0 : i32
    return %arg0, %c0_i32 : i32, i32
  }
  func.func @transform_1(%arg0: i32) -> (i32, i32) {
    %c0_i32 = arith.constant 0 : i32
    %c0_i32_0 = arith.constant 0 : i32
    %c0_i32_1 = arith.constant 0 : i32
    return %c0_i32, %c0_i32_0 : i32, i32
  }
  func.func @transform_2(%arg0: i32) -> (i32, i32) {
    %c0_i32 = arith.constant 0 : i32
    %c0_i32_0 = arith.constant 0 : i32
    %c0_i32_1 = arith.constant 0 : i32
    return %c0_i32, %c0_i32_0 : i32, i32
  }
  func.func @transform_3(%arg0: i32) -> (i32, i32) {
    %c0_i32 = arith.constant 0 : i32
    %c0_i32_0 = arith.constant 0 : i32
    %c0_i32_1 = arith.constant 0 : i32
    return %c0_i32, %c0_i32_0 : i32, i32
  }
  func.func @transform_4(%arg0: i32) -> (i32, i32) {
    %c0_i32 = arith.constant 0 : i32
    %c0_i32_0 = arith.constant 0 : i32
    %c0_i32_1 = arith.constant 0 : i32
    return %c0_i32, %c0_i32_0 : i32, i32
  }
  func.func @transform_5(%arg0: i32) -> (i32, i32) {
    %c0_i32 = arith.constant 0 : i32
    %c0_i32_0 = arith.constant 0 : i32
    %c0_i32_1 = arith.constant 0 : i32
    return %c0_i32, %c0_i32_0 : i32, i32
  }
  func.func @transform_6(%arg0: i32) -> (i32, i32) {
    %c0_i32 = arith.constant 0 : i32
    %c0_i32_0 = arith.constant 0 : i32
    %c0_i32_1 = arith.constant 0 : i32
    return %c0_i32, %c0_i32_0 : i32, i32
  }
  func.func @transform_7(%arg0: i32) -> (i32, i32) {
    %c0_i32 = arith.constant 0 : i32
    %c0_i32_0 = arith.constant 0 : i32
    return %c0_i32, %arg0 : i32, i32
  }
}

</mosaic_0001>

<bundles_post_ra>
// kernel: tpu_custom_call.1
= control target key start
LH: loop header
LB: loop body
LE: loop exit
PB: predicated region body
PF: predicated region fallthrough
CT: control target
= control target key end

     0   :  { %s899_s0 = inlined_call_operand.vmem [shape: f32[8,8], index: 0, kind: input, shape index: {}]   ;;  %s900_s1 = inlined_call_operand.vmem [shape: f32[32,8], index: 1, kind: input, shape index: {}]   ;;  %s901_s2 = inlined_call_operand.vmem [shape: f32[32,1], index: 2, kind: input, shape index: {}]   ;;  %s902_s3 = inlined_call_operand.vmem [shape: f32[32,32], index: 3, kind: input, shape index: {}]   ;;  %s903_s4 = inlined_call_operand.vmem [shape: f32[32,1], index: 4, kind: input, shape index: {}]   ;;  %s904_s5 = inlined_call_operand.vmem [shape: f32[1,32], index: 5, kind: input, shape index: {}]   ;;  %s905_s6 = inlined_call_operand.<no memory space> [shape: f32[1,1], index: 6, kind: input, shape index: {}]   ;;  %s906_s7 = inlined_call_operand.hbm [shape: f32[1,8], index: 7, kind: output, shape index: {}]  }
   0x1   :  { %v12_v0 = vstv %s905_s6 }
   0x2   :  { %13 = vst [vmem:[#allocation2] sm:$0x1] %v12_v0 }
   0x3   :  { %v29_v1 = vld [vmem:[%s899_s0] sm:$0xff]  ;;  %v30_v2 = vld [vmem:[%s899_s0 + $0x8] sm:$0xff]  ;;  %vm73_vm0 = vcmask 64512   ;;  %v31_v3 = vld [vmem:[%s899_s0 + $0x10] sm:$0xff]  ;;  %v693_v7 = vmov 0  }
   0x4   :  { %v580_v4 = vpack.c.bf16 %v30_v2, %v29_v1  ;;  %vm752_vm1 = vmpackc.low %vm73_vm0, %vm73_vm0  ;;  %v32_v6 = vld [vmem:[%s899_s0 + $0x18] sm:$0xff]  ;;  %647 = vset.pattern.permute.xlu0 %v693_v7  ;;  %648 = vset.pattern.permute.xlu1 %v693_v7  ;;  %v45_v9 = vld [vmem:[%s900_s1] sm:$0xff] }
   0x5   :  { %v586_v8 = vpack.c.bf16 %v32_v6, %v31_v3  ;;  %v33_v10 = vld [vmem:[%s899_s0 + $0x20] sm:$0xff]  ;;  %v34_v11 = vld [vmem:[%s899_s0 + $0x28] sm:$0xff]  ;;  %549 = vmatprep.mubr.msk.f32.mxu0 %vm73_vm0, %v45_v9  ;;  %v51_v13 = vld [vmem:[%s901_s2 + $0x10] sm:$0xff] }
   0x6   :  { %582 = vmatprep.subr.msk.bf16.mxu0 %vm752_vm1, %v580_v4  ;;  %v49_v12 = vld [vmem:[%s901_s2] sm:$0xff]  ;;  %65 = vperm.xlu1 %648, %v51_v13   ;;  %v592_v14 = vpack.c.bf16 %v34_v11, %v33_v10  ;;  %v50_v15 = vld [vmem:[%s901_s2 + $0x8] sm:$0xff]  ;;  %v52_v16 = vld [vmem:[%s901_s2 + $0x18] sm:$0xff] }
   0x7   :  { %585 = vmatpush3.bf16.xpose.msk.msra.mxu0 %vm752_vm1, %v580_v4  ;;  %55 = vperm.xlu0 %647, %v49_v12  }
   0x8   :  { %588 = vmatprep.subr.msk.bf16.mxu0 %vm752_vm1, %v586_v8 }
   0x9   :  { %14 = vsyncpa [#allocation4], 0  ;;  %v227_v17 = vld [vmem:[%s903_s4] sm:$0xff]  ;;  %v35_v18 = vld [vmem:[%s899_s0 + $0x30] sm:$0xff]  ;;  %vm251_vm2 = vcmask 261120   ;;  %v694_v62 = vmov 0.0|0.0  }
   0xa   :  { %70 = vperm.xlu1 %648, %v52_v16   ;;  %v36_v19 = vld [vmem:[%s899_s0 + $0x38] sm:$0xff]  ;;  %v228_v20 = vld [vmem:[%s903_s4 + $0x8] sm:$0xff]  ;;  %v229_v22 = vld [vmem:[%s903_s4 + $0x10] sm:$0xff]  ;;  %vm695_vm3 = vmmov 0   ;;  %v696_v63 = vmov 0.0   ;;  %s697_s14 = smov [#allocation3]  }
   0xb   :  { %60 = vperm.xlu0 %647, %v50_v15   ;;  %v598_v21 = vpack.c.bf16 %v36_v19, %v35_v18  ;;  %v230_v23 = vld [vmem:[%s903_s4 + $0x18] sm:$0xff]  ;;  %v354_v24 = vld [vmem:[#allocation2] sm:$0x1]  ;;  %v38_v26 = vld [vmem:[%s899_s0 + $0x48] sm:$0xff]  ;;  %v360_v19 = vlaneseq  ;;  %s450_s4 = sshll.u32 %s697_s14, 4  ;;  %s451_s4 = int_to_ptr.vmem [resolvable:$true] %s450_s4 }
   0xc   :  { %v37_v25 = vld [vmem:[%s899_s0 + $0x40] sm:$0xff]  ;;  %v39_v28 = vld [vmem:[%s899_s0 + $0x50] sm:$0xff]  ;;  %v40_v29 = vld [vmem:[%s899_s0 + $0x58] sm:$0xff]  ;;  %s673_s15 = scalar_lea.vmem %s451_s4, 32  ;;  %p674_p1 = scmp.lt.s32.totalorder %s451_s4, %s451_s4 }
   0xd   :  { %v604_v27 = vpack.c.bf16 %v38_v26, %v37_v25  ;;  %v610_v30 = vpack.c.bf16 %v40_v29, %v39_v28  ;;  %v41_v31 = vld [vmem:[%s899_s0 + $0x60] sm:$0xff]  ;;  %v42_v32 = vld [vmem:[%s899_s0 + $0x68] sm:$0xff]  ;;  %v43_v34 = vld [vmem:[%s899_s0 + $0x70] sm:$0xff] }
   0xe   :  { %238 = vperm.xlu1 %648, %v228_v20   ;;  %v616_v33 = vpack.c.bf16 %v42_v32, %v41_v31  ;;  %v44_v35 = vld [vmem:[%s899_s0 + $0x78] sm:$0xff]  ;;  %v46_v37 = vld [vmem:[%s900_s1 + $0x8] sm:$0xff]  ;;  %v47_v38 = vld [vmem:[%s900_s1 + $0x10] sm:$0xff]  ;;  %v361_v20 = vshrl.u32 %v360_v19, 7 }
   0xf   :  { %591 = vmatpush3.bf16.xpose.msk.msra.mxu0 %vm752_vm1, %v586_v8  ;;  %233 = vperm.xlu0 %647, %v227_v17   ;;  %v622_v36 = vpack.c.bf16 %v44_v35, %v43_v34  ;;  %v48_v39 = vld [vmem:[%s900_s1 + $0x18] sm:$0xff]  ;;  %v223_v40 = vld [vmem:[%s902_s3] sm:$0xff]  ;;  %v224_v59 = vld [vmem:[%s902_s3 + $0x8] sm:$0xff] }
  0x10   :  { %594 = vmatprep.subr.msk.bf16.mxu0 %vm752_vm1, %v592_v14  ;;  %563 = vmatprep.mubr.msk.f32.mxu1 %vm251_vm2, %v223_v40  ;;  %v225_v60 = vld [vmem:[%s902_s3 + $0x10] sm:$0xff]  ;;  %v226_v61 = vld [vmem:[%s902_s3 + $0x18] sm:$0xff]  ;;  %v353_v18 = vld [vmem:[%s904_s5] sm:$0x1]  ;;  %s669_s5 = scalar_lea.vmem %s451_s4, 16 }
  0x11   :  { %p670_p0 = scmp.ne.s32.totalorder %s451_s4, %s669_s5  ;;  %p675_p2 = scmp.lt.s32.totalorder %s673_s15, %s669_s5 }
  0x12   :  { %248 = vperm.xlu1 %648, %v230_v23  }
  0x13   :  { %243 = vperm.xlu0 %647, %v229_v22   ;;  %p676_p3 = por %p675_p2, %p674_p1 }
  0x15   :  { %p677_p4 = pnand %p676_p3, %p670_p0 }
  0x17   :  { %597 = vmatpush3.bf16.xpose.msk.msra.mxu0 %vm752_vm1, %v592_v14  ;;  %357 = vperm.xlu0 %647, %v354_v24  }
  0x18   :  { %600 = vmatprep.subr.msk.bf16.mxu0 %vm752_vm1, %v598_v21 }
  0x1f   :  { %603 = vmatpush3.bf16.xpose.msk.msra.mxu0 %vm752_vm1, %v598_v21  ;;  %v362_v21 = vsub.s32 0, %v361_v20 }
  0x20   :  { %606 = vmatprep.subr.msk.bf16.mxu0 %vm752_vm1, %v604_v27 }
  0x27   :  { %609 = vmatpush3.bf16.xpose.msk.msra.mxu0 %vm752_vm1, %v604_v27 }
  0x28   :  { %612 = vmatprep.subr.msk.bf16.mxu0 %vm752_vm1, %v610_v30 }
  0x2f   :  { %615 = vmatpush3.bf16.xpose.msk.msra.mxu0 %vm752_vm1, %v610_v30 }
  0x30   :  { %618 = vmatprep.subr.msk.bf16.mxu0 %vm752_vm1, %v616_v33 }
  0x37   :  { %621 = vmatpush3.bf16.xpose.msk.msra.mxu0 %vm752_vm1, %v616_v33 }
  0x38   :  { %624 = vmatprep.subr.msk.bf16.mxu0 %vm752_vm1, %v622_v36 }
  0x3f   :  { %627 = vmatpush3.bf16.xpose.msk.msra.mxu0 %vm752_vm1, %v622_v36 }
  0x46   :  { %550 = vmatmul.mubr.msk.f32.vlgmr.msra.gmra.mrb[0].mxu0 %vm73_vm0, %v46_v37 }
  0x47   :  { %552 = vmatprep.mubr.msk.f32.mxu0 %vm73_vm0, %v47_v38 }
  0x4a   :  { %553 = vmatmul.mubr.msk.f32.gmra.mrb[2].mxu0 %vm73_vm0, %v48_v39 }
  0x85   :  { %v66_v42 = vpop.permute.xlu1 %65 }
  0x86   :  { %v56_v41 = vpop.permute.xlu0 %55 }
  0x89   :  { %v71_v48 = vpop.permute.xlu1 %70 }
  0x8a   :  { %v61_v43 = vpop.permute.xlu0 %60 }
  0x8d   :  { %v239_v0 = vpop.permute.xlu1 %238 }
  0x8e   :  { %v234_v1 = vpop.permute.xlu0 %233 }
  0x91   :  { %v249_v6 = vpop.permute.xlu1 %248 }
  0x92   :  { %v244_v8 = vpop.permute.xlu0 %243 }
  0x96   :  { %v358_v22 = vpop.permute.xlu0 %357 }
  0x97   :  { %v363_v23 = vrot.slane %v358_v22, %v362_v21 }
 0x119   :  { %v551_v44 = vpop.f32.mrb[0].mxu0 }
 0x11a   :  { %v206_v45 = vadd.f32 %v551_v44, %v61_v43  ;;  %v200_v46 = vpop.f32.mrb[1].mxu0 }
 0x11b   :  { %v201_v47 = vadd.f32 %v200_v46, %v56_v41 }
 0x11c   :  { %649 = vtanh.f32 %v206_v45 }
 0x11d   :  { %651 = vtanh.f32 %v201_v47  ;;  %v554_v49 = vpop.f32.mrb[2].mxu0 }
 0x11e   :  { %v216_v50 = vadd.f32 %v554_v49, %v71_v48  ;;  %v210_v51 = vpop.f32.mrb[3].mxu0 }
 0x11f   :  { %v211_v52 = vadd.f32 %v210_v51, %v66_v42 }
 0x120   :  { %653 = vtanh.f32 %v216_v50 }
 0x121   :  { %655 = vtanh.f32 %v211_v52 }
 0x126   :  { %v650_v53 = vpop.eup %649 }
 0x127   :  { %v652_v54 = vpop.eup %651 }
 0x128   :  { %v628_v55 = vpack.c.bf16 %v650_v53, %v652_v54 }
 0x12a   :  { %v654_v56 = vpop.eup %653  ;;  %629 = vmatprep.subr.bf16.mxu1 %v628_v55 }
 0x12b   :  { %v656_v57 = vpop.eup %655  ;;  %631 = vmatpush3.bf16.msra.mxu1 %v628_v55 }
 0x12c   :  { %v632_v58 = vpack.c.bf16 %v654_v56, %v656_v57 }
 0x12e   :  { %633 = vmatprep.subr.bf16.mxu1 %v632_v58 }
 0x12f   :  { %635 = vmatpush3.bf16.msra.mxu1 %v632_v58 }
 0x130   :  { %636 = vmatprep.subr.bf16.mxu1 %v694_v62 }
 0x132   :  { %564 = vmatmul.mubr.msk.f32.vlgmr.msra.gmra.mrb[0].mxu1 %vm251_vm2, %v224_v59 }
 0x133   :  { %566 = vmatprep.mubr.msk.f32.mxu1 %vm251_vm2, %v225_v60 }
 0x136   :  { %567 = vmatmul.mubr.msk.f32.gmra.mrb[2].mxu1 %vm251_vm2, %v226_v61 }
 0x137   :  { %577 = vmatprep.mubr.msk.f32.mxu1 %vm695_vm3, %v696_v63 }
 0x205   :  { %v565_v2 = vpop.f32.mrb[0].mxu1 }
 0x206   :  { %v336_v3 = vadd.f32 %v565_v2, %v239_v0  ;;  %v330_v4 = vpop.f32.mrb[1].mxu1 }
 0x207   :  { %v331_v5 = vadd.f32 %v330_v4, %v234_v1 }
 0x208   :  { %657 = vtanh.f32 %v336_v3 }
 0x209   :  { %659 = vtanh.f32 %v331_v5  ;;  %v568_v7 = vpop.f32.mrb[2].mxu1 }
 0x20a   :  { %v346_v9 = vadd.f32 %v568_v7, %v249_v6  ;;  %v340_v10 = vpop.f32.mrb[3].mxu1 }
 0x20b   :  { %v341_v11 = vadd.f32 %v340_v10, %v244_v8 }
 0x20c   :  { %661 = vtanh.f32 %v346_v9 }
 0x20d   :  { %663 = vtanh.f32 %v341_v11 }
 0x212   :  { %v658_v12 = vpop.eup %657 }
 0x213   :  { %v660_v13 = vpop.eup %659 }
 0x214   :  { %v637_v14 = vpack.c.bf16 %v658_v12, %v660_v13 }
 0x216   :  { %v662_v15 = vpop.eup %661  ;;  %638 = vmatpush3.bf16.msra.mxu1 %v637_v14 }
 0x217   :  { %v664_v16 = vpop.eup %663  ;;  %639 = vmatprep.subr.bf16.mxu1 %v694_v62 }
 0x218   :  { %v640_v17 = vpack.c.bf16 %v662_v15, %v664_v16 }
 0x21a   :  { %641 = vmatpush3.bf16.msra.mxu1 %v640_v17 }
 0x21d   :  { %578 = vmatmul.mubr.msk.f32.vlgmr.msra.gmra.mrb[4].mxu1 %vm251_vm2, %v353_v18 }
 0x2f0   :  { %v433_v24 = vpop.f32.mrb[4].mxu1 }
 0x2f1   :  { %v434_v25 = vadd.f32 %v433_v24, %v363_v23  ;;  %v579_v26 = vpop.f32.mrb[5].mxu1 }
 0x2f3   :  { %v483_v27 = vmul.f32 -1.442695, %v434_v25 }
 0x2f5   :  { %665 = vpow2.f32 %v483_v27 }
 0x2ff   :  { %v666_v28 = vpop.eup %665 }
 0x300   :  { %v440_v29 = vadd.f32 1.0, %v666_v28 }
 0x302   :  { %667 = vrcp.f32 %v440_v29 }
 0x30c   :  { %v668_v30 = vpop.eup %667 }
 0x30d   :  { %443 = vst [vmem:[#allocation3] sm:$0x1] %v668_v30 }
 0x30e   :  { %680 = shalt.err (!%p677_p4)
}
 0x30f   :  { %s681_s18 = scalar_lea.hbm %s906_s7, 16 }
 0x310   :  { %p682_p5 = scmp.ne.s32.totalorder %s906_s7, %s681_s18  ;;  %p685_p6 = scmp.lt.u32.totalorder %s681_s18, %s906_s7 }
 0x312   :  { %p687_p7 = pnand %p685_p6, %p682_p5 }
 0x314   :  { %690 = shalt.err (!%p687_p7)
}
 0x315   :  { %453 = dma.vmem_to_hbm [thread:$0]  %s451_s4, 16, %s906_s7, [#allocation4]  }
 0x316   :  { %691 = dma.done.wait [#allocation4], 16  }
 0x317   :  { %692 = vsyncadd [#allocation4], 4294967280 }
 0x318   :  { %457 = vsyncpa [#allocation4], 1 }

</bundles_post_ra>
